<compile_context>
chip_gen: v7x
topology: tpu7x:2x2x1
jax: 0.10.0
libtpu: 0.0.40
codegen_flags: <defaults>
</compile_context>

<pallas_src>
import functools

import jax
import jax.numpy as jnp
from jax.experimental import pallas as pl
from jax.experimental.pallas import tpu as pltpu

_EPS = 1e-5
_INV_SQRT2 = 0.7071067811865476


def _round_up(v, m):
    return (v + m - 1) // m * m


def _resblock_kernel(x_ref, mask_ref, w1_ref, g1_ref, be1_ref,
                     w2_ref, g2_ref, be2_ref, out_ref, pat_ref, *,
                     wpad, n_valid, cin_p, cout_p, is_res, same_channels,
                     compute_dtype):
    P = out_ref.shape[-1]                     # lane axis: N*(H+2)*(W+2), 128-aligned
    mask = mask_ref[...]                      # (1, P) f32: 1.0 on the N*H*W real pixels
    inv_n = 1.0 / float(n_valid)

    def conv3x3(src, w_ref, c_in):
        # src: (c_in, P) f32, zero at all border/pad lanes.
        # Build the (9*c_in, P) im2col patch matrix with static lane rolls
        # (XLU slot, no relayouts), then one lane-dense MXU GEMM with K=9*c_in.
        # The conv bias is deliberately omitted: training-mode BN subtracts the
        # per-channel batch mean, which cancels a per-channel constant exactly.
        for k in range(9):
            dy, dx = divmod(k, 3)
            delta = (dy - 1) * wpad + (dx - 1)        # input offset for this tap
            shift = (-delta) % P                       # jnp.roll convention
            shifted = pltpu.roll(src, shift, 1) if shift else src
            pat_ref[k * c_in:(k + 1) * c_in, :] = shifted.astype(compute_dtype)
        return jnp.dot(w_ref[...], pat_ref[:9 * c_in, :],
                       preferred_element_type=jnp.float32)   # (cout_p, P) f32

    def bn_gelu(z, g_ref, be_ref):
        # BatchNorm2d training-mode (biased) batch stats over the n_valid real
        # pixels only (mask excludes border/pad lanes).  One masked traversal
        # for the moments, then the normalize+affine folded into a single
        # per-channel scale/shift, then exact erf-GELU (EUP).
        zm = z * mask
        s1 = jnp.sum(zm, axis=1, keepdims=True)
        s2 = jnp.sum(z * zm, axis=1, keepdims=True)
        mean = s1 * inv_n
        var = s2 * inv_n - mean * mean
        scale = jax.lax.rsqrt(var + _EPS) * g_ref[...]       # (cout_p, 1)
        shift = be_ref[...] - mean * scale                   # (cout_p, 1)
        y = z * scale + shift
        return 0.5 * y * (1.0 + jax.lax.erf(y * _INV_SQRT2))

    x0 = x_ref[...]                                               # (cin_p, P) f32
    x1 = bn_gelu(conv3x3(x0, w1_ref, cin_p), g1_ref, be1_ref)
    x1z = x1 * mask                     # restore zero padding for the second conv
    x2 = bn_gelu(conv3x3(x1z, w2_ref, cout_p), g2_ref, be2_ref)

    if is_res:
        res = x0 if same_channels else x1
        out = (res + x2) * (1.0 / 1.414)
    else:
        out = x2
    out_ref[...] = out


def residual_conv_block(x_nchw, params, *, is_res, compute_dtype=jnp.float32):
    """Pallas forward of ResidualConvBlock.

    x_nchw: (N, Cin, H, W) float32 (PyTorch layout).
    params: torch-layout (w1, b1, g1, be1, w2, b2, g2, be2).
    compute_dtype: dtype of the MXU matmul inputs (jnp.float32, or jnp.bfloat16
      on v6e/v7x).  Accumulation, BN stats, GELU and the residual stay f32.

    The conv biases b1/b2 are accepted for API fidelity but are not sent to the
    kernel: training-mode BatchNorm's mean subtraction cancels them exactly.
    """
    w1, b1, g1, be1, w2, b2, g2, be2 = params
    del b1, b2
    N, Cin, H, W = x_nchw.shape
    Cout = w1.shape[0]
    same_channels = Cin == Cout

    cr = 8 if jnp.dtype(compute_dtype).itemsize == 4 else 16   # sublane tile
    cin_p, cout_p = _round_up(Cin, cr), _round_up(Cout, cr)
    Hp, Wp = H + 2, W + 2
    S = Hp * Wp
    P = _round_up(N * S, 128)                                  # lane-dense axis

    # ---- layout plumbing (XLA glue): NCHW -> (C, N*(H+2)*(W+2)), zero-padded
    xt = jnp.transpose(x_nchw.astype(jnp.float32), (1, 0, 2, 3))
    xt = jnp.pad(xt, ((0, cin_p - Cin), (0, 0), (1, 1), (1, 1)))
    x_cp = jnp.pad(xt.reshape(cin_p, N * S), ((0, 0), (0, P - N * S)))

    m = jnp.pad(jnp.ones((H, W), jnp.float32), ((1, 1), (1, 1)))
    mask = jnp.pad(jnp.broadcast_to(m, (N, Hp, Wp)).reshape(1, N * S),
                   ((0, 0), (0, P - N * S)))

    def pack_w(w, co_p, ci_p):
        # torch (Cout, Cin, 3, 3) -> (co_p, 9*ci_p); K ordered tap-major,
        # channel-minor to match the in-kernel patch matrix.
        co, ci = w.shape[0], w.shape[1]
        wpd = jnp.pad(w.astype(jnp.float32),
                      ((0, co_p - co), (0, ci_p - ci), (0, 0), (0, 0)))
        wpd = jnp.transpose(wpd, (0, 2, 3, 1)).reshape(co_p, 9 * ci_p)
        return wpd.astype(compute_dtype)

    def pack_c(v, c_p):
        return jnp.pad(v.astype(jnp.float32), (0, c_p - v.shape[0])).reshape(c_p, 1)

    args = (x_cp, mask,
            pack_w(w1, cout_p, cin_p), pack_c(g1, cout_p), pack_c(be1, cout_p),
            pack_w(w2, cout_p, cout_p), pack_c(g2, cout_p), pack_c(be2, cout_p))

    pat_rows = 9 * max(cin_p, cout_p)
    esize = jnp.dtype(compute_dtype).itemsize
    est = (sum(int(a.size) * a.dtype.itemsize for a in args)
           + cout_p * P * 4                       # output
           + pat_rows * P * esize                 # im2col scratch
           + 6 * max(cin_p, cout_p) * P * 4)      # live intermediates, headroom
    if est > 40 * 2**20:
        # TODO(synk): tiled two-pass-BN path for activations larger than VMEM.
        raise NotImplementedError(
            "activation too large for the single fused VMEM-resident path")

    kernel = functools.partial(
        _resblock_kernel, wpad=Wp, n_valid=N * H * W, cin_p=cin_p,
        cout_p=cout_p, is_res=is_res, same_channels=same_channels,
        compute_dtype=compute_dtype)

    vmem = pl.BlockSpec(memory_space=pltpu.MemorySpace.VMEM)
    out_cp = pl.pallas_call(
        kernel,
        out_shape=jax.ShapeDtypeStruct((cout_p, P), jnp.float32),
        in_specs=[vmem] * len(args),
        out_specs=vmem,
        scratch_shapes=[pltpu.VMEM((pat_rows, P), compute_dtype)],
        compiler_params=pltpu.CompilerParams(
            vmem_limit_bytes=int(min(48 * 2**20, max(16 * 2**20, 4 * est)))),
    )(*args)

    # ---- back to NCHW: drop lane padding, channel padding and the halo border
    out = out_cp[:Cout, :N * S].reshape(Cout, N, Hp, Wp)[:, :, 1:H + 1, 1:W + 1]
    return jnp.transpose(out, (1, 0, 2, 3))


def init_params(key, in_channels, out_channels):
    """Deterministic synthetic parameters in PyTorch layouts.

    conv weight (Cout, Cin, 3, 3), bias (Cout,); BN gamma=1, beta=0."""
    k1, k2, k3, k4 = jax.random.split(key, 4)

    def conv_w(k, cin, cout):
        bound = 1.0 / jnp.sqrt(cin * 9.0)
        return jax.random.uniform(k, (cout, cin, 3, 3), jnp.float32, -bound, bound)

    def conv_b(k, cin, cout):
        bound = 1.0 / jnp.sqrt(cin * 9.0)
        return jax.random.uniform(k, (cout,), jnp.float32, -bound, bound)

    w1 = conv_w(k1, in_channels, out_channels)
    b1 = conv_b(k2, in_channels, out_channels)
    w2 = conv_w(k3, out_channels, out_channels)
    b2 = conv_b(k4, out_channels, out_channels)
    ones = jnp.ones((out_channels,), jnp.float32)
    zeros = jnp.zeros((out_channels,), jnp.float32)
    return (w1, b1, ones, zeros, w2, b2, ones, zeros)


def _reference(x_nchw, params, *, is_res):
    """Pure-JAX reference mirroring the PyTorch forward (training-mode BN)."""
    w1, b1, g1, be1, w2, b2, g2, be2 = params
    x = jnp.transpose(x_nchw, (0, 2, 3, 1)).astype(jnp.float32)
    same_channels = x.shape[-1] == w1.shape[0]

    def conv(x, w, b):
        wh = jnp.transpose(w, (2, 3, 1, 0))                 # (Cout,Cin,3,3)->HWIO
        y = jax.lax.conv_general_dilated(
            x, wh, window_strides=(1, 1), padding='SAME',
            dimension_numbers=('NHWC', 'HWIO', 'NHWC'))
        return y + b.reshape(1, 1, 1, -1)

    def bn_gelu(z, g, be):
        mean = jnp.mean(z, axis=(0, 1, 2), keepdims=True)
        var = jnp.mean((z - mean) ** 2, axis=(0, 1, 2), keepdims=True)
        y = (z - mean) / jnp.sqrt(var + _EPS)
        y = y * g.reshape(1, 1, 1, -1) + be.reshape(1, 1, 1, -1)
        return 0.5 * y * (1.0 + jax.lax.erf(y * _INV_SQRT2))

    x1 = bn_gelu(conv(x, w1, b1), g1, be1)
    x2 = bn_gelu(conv(x1, w2, b2), g2, be2)
    if is_res:
        out = (x + x2) / 1.414 if same_channels else (x1 + x2) / 1.414
    else:
        out = x2
    return jnp.transpose(out, (0, 3, 1, 2))


if __name__ == "__main__":
    key = jax.random.PRNGKey(0)
    kx, kp = jax.random.split(key)
    kp1, kp2 = jax.random.split(kp)

    N, C, H, W = 2, 4, 16, 16
    x = jax.random.normal(kx, (N, C, H, W), jnp.float32)

    # 1) residual, same channels, f32 MXU path (exact vs reference; also
    #    validates the conv-bias-cancellation optimization).
    params = init_params(kp1, in_channels=C, out_channels=C)
    ref = jax.block_until_ready(_reference(x, params, is_res=True))
    out = jax.block_until_ready(residual_conv_block(x, params, is_res=True))
    assert out.shape == (N, C, H, W)
    assert jnp.allclose(out, ref, rtol=1e-4, atol=1e-4), "f32 mismatch vs reference"

    # 2) residual, different channel count (exercises the x1-residual branch
    #    and channel padding), f32 MXU path
    params2 = init_params(kp2, in_channels=C, out_channels=8)
    ref2 = jax.block_until_ready(_reference(x, params2, is_res=True))
    out2 = jax.block_until_ready(residual_conv_block(x, params2, is_res=True))
    assert out2.shape == (N, 8, H, W)
    assert jnp.allclose(out2, ref2, rtol=1e-4, atol=1e-4), "f32 mismatch (Cin!=Cout)"

    # 3) non-residual path
    ref3 = jax.block_until_ready(_reference(x, params, is_res=False))
    out3 = jax.block_until_ready(residual_conv_block(x, params, is_res=False))
    assert jnp.allclose(out3, ref3, rtol=1e-4, atol=1e-4), "f32 mismatch (is_res=False)"

    # 4) bf16 MXU-input path (v6e/v7x): f32 accumulation + f32 BN/GELU,
    #    checked with a bf16-appropriate tolerance.
    out_bf16 = jax.block_until_ready(
        residual_conv_block(x, params, is_res=True, compute_dtype=jnp.bfloat16))
    assert jnp.allclose(out_bf16, ref, rtol=5e-2, atol=5e-2), "bf16 mismatch"

    print("KERNEL_OK")
</pallas_src>

<mosaic_0001>
module attributes {stable_mosaic.version = 11 : i64} {
  func.func @_resblock_kernel(%arg0: memref<8x768xf32, #tpu.memory_space<vmem>>, %arg1: memref<1x768xf32, #tpu.memory_space<vmem>>, %arg2: memref<8x72xf32, #tpu.memory_space<vmem>>, %arg3: memref<8x1xf32, #tpu.memory_space<vmem>>, %arg4: memref<8x1xf32, #tpu.memory_space<vmem>>, %arg5: memref<8x72xf32, #tpu.memory_space<vmem>>, %arg6: memref<8x1xf32, #tpu.memory_space<vmem>>, %arg7: memref<8x1xf32, #tpu.memory_space<vmem>>, %arg8: memref<8x768xf32, #tpu.memory_space<vmem>>, %arg9: memref<72x768xf32, #tpu.memory_space<vmem>>) attributes {dimension_semantics = [], scalar_prefetch = 0 : i64, scratch_operands = 1 : i64, tpu.core_type = #tpu.core_type<tc>} {
    %c0 = arith.constant 0 : index
    %c0_0 = arith.constant 0 : index
    %0 = vector.load %arg1[%c0, %c0_0] : memref<1x768xf32, #tpu.memory_space<vmem>>, vector<1x768xf32>
    %c0_1 = arith.constant 0 : index
    %c0_2 = arith.constant 0 : index
    %1 = vector.load %arg0[%c0_1, %c0_2] : memref<8x768xf32, #tpu.memory_space<vmem>>, vector<8x768xf32>
    %c19_i32 = arith.constant 19 : i32
    %2 = tpu.dynamic_rotate %1 by %c19_i32 dim 1 : vector<8x768xf32>, i32 -> vector<8x768xf32>
    %c0_3 = arith.constant 0 : index
    %c0_4 = arith.constant 0 : index
    %3 = vector.load %arg9[%c0_3, %c0_4] : memref<72x768xf32, #tpu.memory_space<vmem>>, vector<8x768xf32>
    tpu.vector_store %arg9[%c0_3, %c0_4], %2 {strides = array<i32>} : memref<72x768xf32, #tpu.memory_space<vmem>>, vector<8x768xf32>,
    %c18_i32 = arith.constant 18 : i32
    %4 = tpu.dynamic_rotate %1 by %c18_i32 dim 1 : vector<8x768xf32>, i32 -> vector<8x768xf32>
    %c8 = arith.constant 8 : index
    %c0_5 = arith.constant 0 : index
    %5 = vector.load %arg9[%c8, %c0_5] : memref<72x768xf32, #tpu.memory_space<vmem>>, vector<8x768xf32>
    tpu.vector_store %arg9[%c8, %c0_5], %4 {strides = array<i32>} : memref<72x768xf32, #tpu.memory_space<vmem>>, vector<8x768xf32>,
    %c17_i32 = arith.constant 17 : i32
    %6 = tpu.dynamic_rotate %1 by %c17_i32 dim 1 : vector<8x768xf32>, i32 -> vector<8x768xf32>
    %c16 = arith.constant 16 : index
    %c0_6 = arith.constant 0 : index
    %7 = vector.load %arg9[%c16, %c0_6] : memref<72x768xf32, #tpu.memory_space<vmem>>, vector<8x768xf32>
    tpu.vector_store %arg9[%c16, %c0_6], %6 {strides = array<i32>} : memref<72x768xf32, #tpu.memory_space<vmem>>, vector<8x768xf32>,
    %c1_i32 = arith.constant 1 : i32
    %8 = tpu.dynamic_rotate %1 by %c1_i32 dim 1 : vector<8x768xf32>, i32 -> vector<8x768xf32>
    %c24 = arith.constant 24 : index
    %c0_7 = arith.constant 0 : index
    %9 = vector.load %arg9[%c24, %c0_7] : memref<72x768xf32, #tpu.memory_space<vmem>>, vector<8x768xf32>
    tpu.vector_store %arg9[%c24, %c0_7], %8 {strides = array<i32>} : memref<72x768xf32, #tpu.memory_space<vmem>>, vector<8x768xf32>,
    %c32 = arith.constant 32 : index
    %c0_8 = arith.constant 0 : index
    %10 = vector.load %arg9[%c32, %c0_8] : memref<72x768xf32, #tpu.memory_space<vmem>>, vector<8x768xf32>
    tpu.vector_store %arg9[%c32, %c0_8], %1 {strides = array<i32>} : memref<72x768xf32, #tpu.memory_space<vmem>>, vector<8x768xf32>,
    %c767_i32 = arith.constant 767 : i32
    %11 = tpu.dynamic_rotate %1 by %c767_i32 dim 1 : vector<8x768xf32>, i32 -> vector<8x768xf32>
    %c40 = arith.constant 40 : index
    %c0_9 = arith.constant 0 : index
    %12 = vector.load %arg9[%c40, %c0_9] : memref<72x768xf32, #tpu.memory_space<vmem>>, vector<8x768xf32>
    tpu.vector_store %arg9[%c40, %c0_9], %11 {strides = array<i32>} : memref<72x768xf32, #tpu.memory_space<vmem>>, vector<8x768xf32>,
    %c751_i32 = arith.constant 751 : i32
    %13 = tpu.dynamic_rotate %1 by %c751_i32 dim 1 : vector<8x768xf32>, i32 -> vector<8x768xf32>
    %c48 = arith.constant 48 : index
    %c0_10 = arith.constant 0 : index
    %14 = vector.load %arg9[%c48, %c0_10] : memref<72x768xf32, #tpu.memory_space<vmem>>, vector<8x768xf32>
    tpu.vector_store %arg9[%c48, %c0_10], %13 {strides = array<i32>} : memref<72x768xf32, #tpu.memory_space<vmem>>, vector<8x768xf32>,
    %c750_i32 = arith.constant 750 : i32
    %15 = tpu.dynamic_rotate %1 by %c750_i32 dim 1 : vector<8x768xf32>, i32 -> vector<8x768xf32>
    %c56 = arith.constant 56 : index
    %c0_11 = arith.constant 0 : index
    %16 = vector.load %arg9[%c56, %c0_11] : memref<72x768xf32, #tpu.memory_space<vmem>>, vector<8x768xf32>
    tpu.vector_store %arg9[%c56, %c0_11], %15 {strides = array<i32>} : memref<72x768xf32, #tpu.memory_space<vmem>>, vector<8x768xf32>,
    %c749_i32 = arith.constant 749 : i32
    %17 = tpu.dynamic_rotate %1 by %c749_i32 dim 1 : vector<8x768xf32>, i32 -> vector<8x768xf32>
    %c64 = arith.constant 64 : index
    %c0_12 = arith.constant 0 : index
    %18 = vector.load %arg9[%c64, %c0_12] : memref<72x768xf32, #tpu.memory_space<vmem>>, vector<8x768xf32>
    tpu.vector_store %arg9[%c64, %c0_12], %17 {strides = array<i32>} : memref<72x768xf32, #tpu.memory_space<vmem>>, vector<8x768xf32>,
    %c0_13 = arith.constant 0 : index
    %c0_14 = arith.constant 0 : index
    %19 = vector.load %arg2[%c0_13, %c0_14] : memref<8x72xf32, #tpu.memory_space<vmem>>, vector<8x72xf32>
    %c0_15 = arith.constant 0 : index
    %c0_16 = arith.constant 0 : index
    %20 = vector.load %arg9[%c0_15, %c0_16] : memref<72x768xf32, #tpu.memory_space<vmem>>, vector<72x768xf32>
    %cst = arith.constant dense<0.000000e+00> : vector<8x768xf32>
    %21 = tpu.matmul %19, %20, %cst {dimension_numbers = #tpu.dot_dimension_numbers<[1], [0], [0], [1], [0, 0, 1, 1], [], []>} : vector<8x72xf32>, vector<72x768xf32>, vector<8x768xf32> -> vector<8x768xf32>
    %22 = vector.broadcast %0 : vector<1x768xf32> to vector<8x768xf32>
    %23 = arith.mulf %21, %22 : vector<8x768xf32>
    %cst_17 = arith.constant dense<0.000000e+00> : vector<8xf32>
    %24 = vector.multi_reduction <add>, %23, %cst_17 [1] : vector<8x768xf32> to vector<8xf32>
    %25 = vector.shape_cast %24 : vector<8xf32> to vector<8x1xf32>
    %26 = arith.mulf %21, %23 : vector<8x768xf32>
    %cst_18 = arith.constant dense<0.000000e+00> : vector<8xf32>
    %27 = vector.multi_reduction <add>, %26, %cst_18 [1] : vector<8x768xf32> to vector<8xf32>
    %28 = vector.shape_cast %27 : vector<8xf32> to vector<8x1xf32>
    %cst_19 = arith.constant 0.001953125 : f32
    %29 = vector.broadcast %cst_19 : f32 to vector<8x1xf32>
    %30 = arith.mulf %25, %29 : vector<8x1xf32>
    %cst_20 = arith.constant 0.001953125 : f32
    %31 = vector.broadcast %cst_20 : f32 to vector<8x1xf32>
    %32 = arith.mulf %28, %31 : vector<8x1xf32>
    %33 = arith.mulf %30, %30 : vector<8x1xf32>
    %34 = arith.subf %32, %33 : vector<8x1xf32>
    %cst_21 = arith.constant 9.99999974E-6 : f32
    %35 = vector.broadcast %cst_21 : f32 to vector<8x1xf32>
    %36 = arith.addf %34, %35 : vector<8x1xf32>
    %37 = math.rsqrt %36 : vector<8x1xf32>
    %c0_22 = arith.constant 0 : index
    %c0_23 = arith.constant 0 : index
    %38 = vector.load %arg3[%c0_22, %c0_23] : memref<8x1xf32, #tpu.memory_space<vmem>>, vector<8x1xf32>
    %39 = arith.mulf %37, %38 : vector<8x1xf32>
    %c0_24 = arith.constant 0 : index
    %c0_25 = arith.constant 0 : index
    %40 = vector.load %arg4[%c0_24, %c0_25] : memref<8x1xf32, #tpu.memory_space<vmem>>, vector<8x1xf32>
    %41 = arith.mulf %30, %39 : vector<8x1xf32>
    %42 = arith.subf %40, %41 : vector<8x1xf32>
    %43 = vector.broadcast %39 : vector<8x1xf32> to vector<8x768xf32>
    %44 = arith.mulf %21, %43 : vector<8x768xf32>
    %45 = vector.broadcast %42 : vector<8x1xf32> to vector<8x768xf32>
    %46 = arith.addf %44, %45 : vector<8x768xf32>
    %cst_26 = arith.constant 5.000000e-01 : f32
    %47 = vector.broadcast %cst_26 : f32 to vector<8x768xf32>
    %48 = arith.mulf %47, %46 : vector<8x768xf32>
    %cst_27 = arith.constant 0.707106769 : f32
    %49 = vector.broadcast %cst_27 : f32 to vector<8x768xf32>
    %50 = arith.mulf %46, %49 : vector<8x768xf32>
    %51 = math.erf %50 : vector<8x768xf32>
    %cst_28 = arith.constant 1.000000e+00 : f32
    %52 = vector.broadcast %cst_28 : f32 to vector<8x768xf32>
    %53 = arith.addf %52, %51 : vector<8x768xf32>
    %54 = arith.mulf %48, %53 : vector<8x768xf32>
    %55 = vector.broadcast %0 : vector<1x768xf32> to vector<8x768xf32>
    %56 = arith.mulf %54, %55 : vector<8x768xf32>
    %c19_i32_29 = arith.constant 19 : i32
    %57 = tpu.dynamic_rotate %56 by %c19_i32_29 dim 1 : vector<8x768xf32>, i32 -> vector<8x768xf32>
    %c0_30 = arith.constant 0 : index
    %c0_31 = arith.constant 0 : index
    %58 = vector.load %arg9[%c0_30, %c0_31] : memref<72x768xf32, #tpu.memory_space<vmem>>, vector<8x768xf32>
    tpu.vector_store %arg9[%c0_30, %c0_31], %57 {strides = array<i32>} : memref<72x768xf32, #tpu.memory_space<vmem>>, vector<8x768xf32>,
    %c18_i32_32 = arith.constant 18 : i32
    %59 = tpu.dynamic_rotate %56 by %c18_i32_32 dim 1 : vector<8x768xf32>, i32 -> vector<8x768xf32>
    %c8_33 = arith.constant 8 : index
    %c0_34 = arith.constant 0 : index
    %60 = vector.load %arg9[%c8_33, %c0_34] : memref<72x768xf32, #tpu.memory_space<vmem>>, vector<8x768xf32>
    tpu.vector_store %arg9[%c8_33, %c0_34], %59 {strides = array<i32>} : memref<72x768xf32, #tpu.memory_space<vmem>>, vector<8x768xf32>,
    %c17_i32_35 = arith.constant 17 : i32
    %61 = tpu.dynamic_rotate %56 by %c17_i32_35 dim 1 : vector<8x768xf32>, i32 -> vector<8x768xf32>
    %c16_36 = arith.constant 16 : index
    %c0_37 = arith.constant 0 : index
    %62 = vector.load %arg9[%c16_36, %c0_37] : memref<72x768xf32, #tpu.memory_space<vmem>>, vector<8x768xf32>
    tpu.vector_store %arg9[%c16_36, %c0_37], %61 {strides = array<i32>} : memref<72x768xf32, #tpu.memory_space<vmem>>, vector<8x768xf32>,
    %c1_i32_38 = arith.constant 1 : i32
    %63 = tpu.dynamic_rotate %56 by %c1_i32_38 dim 1 : vector<8x768xf32>, i32 -> vector<8x768xf32>
    %c24_39 = arith.constant 24 : index
    %c0_40 = arith.constant 0 : index
    %64 = vector.load %arg9[%c24_39, %c0_40] : memref<72x768xf32, #tpu.memory_space<vmem>>, vector<8x768xf32>
    tpu.vector_store %arg9[%c24_39, %c0_40], %63 {strides = array<i32>} : memref<72x768xf32, #tpu.memory_space<vmem>>, vector<8x768xf32>,
    %c32_41 = arith.constant 32 : index
    %c0_42 = arith.constant 0 : index
    %65 = vector.load %arg9[%c32_41, %c0_42] : memref<72x768xf32, #tpu.memory_space<vmem>>, vector<8x768xf32>
    tpu.vector_store %arg9[%c32_41, %c0_42], %56 {strides = array<i32>} : memref<72x768xf32, #tpu.memory_space<vmem>>, vector<8x768xf32>,
    %c767_i32_43 = arith.constant 767 : i32
    %66 = tpu.dynamic_rotate %56 by %c767_i32_43 dim 1 : vector<8x768xf32>, i32 -> vector<8x768xf32>
    %c40_44 = arith.constant 40 : index
    %c0_45 = arith.constant 0 : index
    %67 = vector.load %arg9[%c40_44, %c0_45] : memref<72x768xf32, #tpu.memory_space<vmem>>, vector<8x768xf32>
    tpu.vector_store %arg9[%c40_44, %c0_45], %66 {strides = array<i32>} : memref<72x768xf32, #tpu.memory_space<vmem>>, vector<8x768xf32>,
    %c751_i32_46 = arith.constant 751 : i32
    %68 = tpu.dynamic_rotate %56 by %c751_i32_46 dim 1 : vector<8x768xf32>, i32 -> vector<8x768xf32>
    %c48_47 = arith.constant 48 : index
    %c0_48 = arith.constant 0 : index
    %69 = vector.load %arg9[%c48_47, %c0_48] : memref<72x768xf32, #tpu.memory_space<vmem>>, vector<8x768xf32>
    tpu.vector_store %arg9[%c48_47, %c0_48], %68 {strides = array<i32>} : memref<72x768xf32, #tpu.memory_space<vmem>>, vector<8x768xf32>,
    %c750_i32_49 = arith.constant 750 : i32
    %70 = tpu.dynamic_rotate %56 by %c750_i32_49 dim 1 : vector<8x768xf32>, i32 -> vector<8x768xf32>
    %c56_50 = arith.constant 56 : index
    %c0_51 = arith.constant 0 : index
    %71 = vector.load %arg9[%c56_50, %c0_51] : memref<72x768xf32, #tpu.memory_space<vmem>>, vector<8x768xf32>
    tpu.vector_store %arg9[%c56_50, %c0_51], %70 {strides = array<i32>} : memref<72x768xf32, #tpu.memory_space<vmem>>, vector<8x768xf32>,
    %c749_i32_52 = arith.constant 749 : i32
    %72 = tpu.dynamic_rotate %56 by %c749_i32_52 dim 1 : vector<8x768xf32>, i32 -> vector<8x768xf32>
    %c64_53 = arith.constant 64 : index
    %c0_54 = arith.constant 0 : index
    %73 = vector.load %arg9[%c64_53, %c0_54] : memref<72x768xf32, #tpu.memory_space<vmem>>, vector<8x768xf32>
    tpu.vector_store %arg9[%c64_53, %c0_54], %72 {strides = array<i32>} : memref<72x768xf32, #tpu.memory_space<vmem>>, vector<8x768xf32>,
    %c0_55 = arith.constant 0 : index
    %c0_56 = arith.constant 0 : index
    %74 = vector.load %arg5[%c0_55, %c0_56] : memref<8x72xf32, #tpu.memory_space<vmem>>, vector<8x72xf32>
    %c0_57 = arith.constant 0 : index
    %c0_58 = arith.constant 0 : index
    %75 = vector.load %arg9[%c0_57, %c0_58] : memref<72x768xf32, #tpu.memory_space<vmem>>, vector<72x768xf32>
    %cst_59 = arith.constant dense<0.000000e+00> : vector<8x768xf32>
    %76 = tpu.matmul %74, %75, %cst_59 {dimension_numbers = #tpu.dot_dimension_numbers<[1], [0], [0], [1], [0, 0, 1, 1], [], []>} : vector<8x72xf32>, vector<72x768xf32>, vector<8x768xf32> -> vector<8x768xf32>
    %77 = vector.broadcast %0 : vector<1x768xf32> to vector<8x768xf32>
    %78 = arith.mulf %76, %77 : vector<8x768xf32>
    %cst_60 = arith.constant dense<0.000000e+00> : vector<8xf32>
    %79 = vector.multi_reduction <add>, %78, %cst_60 [1] : vector<8x768xf32> to vector<8xf32>
    %80 = vector.shape_cast %79 : vector<8xf32> to vector<8x1xf32>
    %81 = arith.mulf %76, %78 : vector<8x768xf32>
    %cst_61 = arith.constant dense<0.000000e+00> : vector<8xf32>
    %82 = vector.multi_reduction <add>, %81, %cst_61 [1] : vector<8x768xf32> to vector<8xf32>
    %83 = vector.shape_cast %82 : vector<8xf32> to vector<8x1xf32>
    %cst_62 = arith.constant 0.001953125 : f32
    %84 = vector.broadcast %cst_62 : f32 to vector<8x1xf32>
    %85 = arith.mulf %80, %84 : vector<8x1xf32>
    %cst_63 = arith.constant 0.001953125 : f32
    %86 = vector.broadcast %cst_63 : f32 to vector<8x1xf32>
    %87 = arith.mulf %83, %86 : vector<8x1xf32>
    %88 = arith.mulf %85, %85 : vector<8x1xf32>
    %89 = arith.subf %87, %88 : vector<8x1xf32>
    %cst_64 = arith.constant 9.99999974E-6 : f32
    %90 = vector.broadcast %cst_64 : f32 to vector<8x1xf32>
    %91 = arith.addf %89, %90 : vector<8x1xf32>
    %92 = math.rsqrt %91 : vector<8x1xf32>
    %c0_65 = arith.constant 0 : index
    %c0_66 = arith.constant 0 : index
    %93 = vector.load %arg6[%c0_65, %c0_66] : memref<8x1xf32, #tpu.memory_space<vmem>>, vector<8x1xf32>
    %94 = arith.mulf %92, %93 : vector<8x1xf32>
    %c0_67 = arith.constant 0 : index
    %c0_68 = arith.constant 0 : index
    %95 = vector.load %arg7[%c0_67, %c0_68] : memref<8x1xf32, #tpu.memory_space<vmem>>, vector<8x1xf32>
    %96 = arith.mulf %85, %94 : vector<8x1xf32>
    %97 = arith.subf %95, %96 : vector<8x1xf32>
    %98 = vector.broadcast %94 : vector<8x1xf32> to vector<8x768xf32>
    %99 = arith.mulf %76, %98 : vector<8x768xf32>
    %100 = vector.broadcast %97 : vector<8x1xf32> to vector<8x768xf32>
    %101 = arith.addf %99, %100 : vector<8x768xf32>
    %cst_69 = arith.constant 5.000000e-01 : f32
    %102 = vector.broadcast %cst_69 : f32 to vector<8x768xf32>
    %103 = arith.mulf %102, %101 : vector<8x768xf32>
    %cst_70 = arith.constant 0.707106769 : f32
    %104 = vector.broadcast %cst_70 : f32 to vector<8x768xf32>
    %105 = arith.mulf %101, %104 : vector<8x768xf32>
    %106 = math.erf %105 : vector<8x768xf32>
    %cst_71 = arith.constant 1.000000e+00 : f32
    %107 = vector.broadcast %cst_71 : f32 to vector<8x768xf32>
    %108 = arith.addf %107, %106 : vector<8x768xf32>
    %109 = arith.mulf %103, %108 : vector<8x768xf32>
    %110 = arith.addf %1, %109 : vector<8x768xf32>
    %cst_72 = arith.constant 0.70721358 : f32
    %111 = vector.broadcast %cst_72 : f32 to vector<8x768xf32>
    %112 = arith.mulf %110, %111 : vector<8x768xf32>
    %c0_73 = arith.constant 0 : index
    %c0_74 = arith.constant 0 : index
    %113 = vector.load %arg8[%c0_73, %c0_74] : memref<8x768xf32, #tpu.memory_space<vmem>>, vector<8x768xf32>
    tpu.vector_store %arg8[%c0_73, %c0_74], %112 {strides = array<i32>} : memref<8x768xf32, #tpu.memory_space<vmem>>, vector<8x768xf32>,
    return
  }
}

</mosaic_0001>

<bundles_post_ra>
// kernel: tpu_custom_call.1
= control target key start
LH: loop header
LB: loop body
LE: loop exit
PB: predicated region body
PF: predicated region fallthrough
CT: control target
= control target key end

     0   :  { %13 = vsyncpa [#allocation4], 0  ;;  %s2334_s0 = inlined_call_operand.hbm [shape: f32[8,768], index: 0, kind: input, shape index: {}]   ;;  %s2335_s1 = inlined_call_operand.vmem [shape: f32[1,768], index: 1, kind: input, shape index: {}]   ;;  %s2336_s2 = inlined_call_operand.vmem [shape: f32[8,72], index: 2, kind: input, shape index: {}]   ;;  %s2337_s3 = inlined_call_operand.vmem [shape: f32[8,1], index: 3, kind: input, shape index: {}]   ;;  %s2338_s4 = inlined_call_operand.vmem [shape: f32[8,1], index: 4, kind: input, shape index: {}]   ;;  %s2339_s5 = inlined_call_operand.vmem [shape: f32[8,72], index: 5, kind: input, shape index: {}]   ;;  %s2340_s6 = inlined_call_operand.vmem [shape: f32[8,1], index: 6, kind: input, shape index: {}]   ;;  %s2341_s7 = inlined_call_operand.vmem [shape: f32[8,1], index: 7, kind: input, shape index: {}]   ;;  %s2342_s8 = inlined_call_operand.hbm [shape: f32[8,768], index: 8, kind: output, shape index: {}]  }
   0x1   :  { %14 = vsyncpa [#allocation5], 0  ;;  %s1624_s27 = smov [#allocation3]   ;;  %s1576_s9 = scalar_lea.hbm %s2334_s0, 768 }
   0x2   :  { %s21_s28 = sshll.u32 %s1624_s27, 4  ;;  %p1577_p0 = scmp.ne.s32.totalorder %s2334_s0, %s1576_s9  ;;  %s22_s28 = int_to_ptr.vmem [resolvable:$true] %s21_s28 }
   0x3   :  { %p1580_p1 = scmp.lt.u32.totalorder %s1576_s9, %s2334_s0 }
   0x5   :  { %p1582_p2 = pnand %p1580_p1, %p1577_p0 }
   0x7   :  { %1585 = shalt.err (!%p1582_p2)
}
   0x8   :  { %s1586_s14 = scalar_lea.vmem %s22_s28, 768  ;;  %p1591_p4 = scmp.lt.s32.totalorder %s22_s28, %s22_s28 }
   0x9   :  { %p1587_p3 = scmp.ne.s32.totalorder %s22_s28, %s1586_s14  ;;  %p1592_p5 = scmp.lt.s32.totalorder %s1586_s14, %s1586_s14 }
   0xb   :  { %p1593_p6 = por %p1592_p5, %p1591_p4 }
   0xd   :  { %p1594_p7 = pnand %p1593_p6, %p1587_p3 }
   0xf   :  { %1597 = shalt.err (!%p1594_p7)
}
  0x10   :  { %24 = dma.hbm_to_vmem [thread:$0]  %s2334_s0, 768, %s22_s28, [#allocation4]  }
  0x11   :  { %1620 = dma.done.wait [#allocation4], 768  }
  0x12   :  { %1621 = vsyncadd [#allocation4], 4294966528  ;;  %v1693_v0 = vld [vmem:[#allocation3 + $0x10] sm:$0xff]  ;;  %v1695_v1 = vld [vmem:[#allocation3 + $0x28] sm:$0xff]  ;;  %s1625_s17 = smov 19   ;;  %s1626_s0 = smov 18   ;;  %v61_v11 = vlaneseq }
  0x13   :  { %v1697_v2 = vld [vmem:[#allocation3] sm:$0xff]  ;;  %v1370_v3 = vpack.i.bf16 %v1693_v0, %v1695_v1  ;;  %v1701_v4 = vld [vmem:[#allocation3 + $0x8] sm:$0xff]  ;;  %s1627_s18 = smov 1   ;;  %s1628_s19 = smov 17   ;;  %v1720_v7 = vld [vmem:[#allocation3 + $0x18] sm:$0xff]  ;;  %v1632_v10 = vmov 0.0  }
  0x14   :  { %v1360_v5 = vpack.i.bf16 %v1701_v4, %v1697_v2  ;;  %v1400_v6 = vpack.i.bf16 %v1693_v0, %v1701_v4  ;;  %s1629_s20 = smov 127   ;;  %s1630_s21 = smov 110   ;;  %v1722_v8 = vld [vmem:[#allocation3 + $0x20] sm:$0xff]  ;;  %380 = vmatprep.mubr.f32.mxu0 %v1632_v10  ;;  %451 = vmatprep.mubr.f32.mxu1 %v1632_v10  ;;  %v1762_v14 = vand.u32 127, %v61_v11  ;;  %vm312_vm8 = vcmask 588800  }
  0x15   :  { %1371 = vrot.lane.b32.xlu1 %v1370_v3, %s1625_s17  ;;  %s1631_s22 = smov 111   ;;  %v1420_v9 = vpack.i.bf16 %v1722_v8, %v1720_v7  ;;  %s1633_s23 = smov 109  }
  0x16   :  { %1361 = vrot.lane.b32.xlu0 %v1360_v5, %s1625_s17  ;;  %vm63_vm0 = vcmp.lt.s32.totalorder %v1762_v14, 19  ;;  %vm88_vm1 = vcmp.lt.s32.totalorder %v1762_v14, 18  ;;  %vm113_vm2 = vcmp.lt.s32.totalorder %v1762_v14, 17  ;;  %vm138_vm3 = vcmp.lt.s32.totalorder %v1762_v14, 1 }
  0x17   :  { %vm169_vm4 = vcmp.lt.s32.totalorder %v1762_v14, 127  ;;  %vm219_vm5 = vcmp.lt.s32.totalorder %v1762_v14, 110  ;;  %vm194_vm6 = vcmp.lt.s32.totalorder %v1762_v14, 111  ;;  %vm244_vm7 = vcmp.lt.s32.totalorder %v1762_v14, 109 }
  0x19   :  { %1376 = vrot.lane.b32.xlu1 %v1370_v3, %s1626_s0 }
  0x1a   :  { %1366 = vrot.lane.b32.xlu0 %v1360_v5, %s1626_s0 }
  0x1d   :  { %1386 = vrot.lane.b32.xlu1 %v1360_v5, %s1627_s18 }
  0x1e   :  { %1381 = vrot.lane.b32.xlu0 %v1360_v5, %s1628_s19 }
  0x21   :  { %1396 = vrot.lane.b32.xlu1 %v1370_v3, %s1627_s18 }
  0x22   :  { %1391 = vrot.lane.b32.xlu0 %v1370_v3, %s1628_s19 }
  0x25   :  { %157 = vrot.lane.b32.xlu1 %v1697_v2, %s1629_s20 }
  0x26   :  { %1401 = vrot.lane.b32.xlu0 %v1400_v6, %s1629_s20 }
  0x29   :  { %1411 = vrot.lane.b32.xlu1 %v1400_v6, %s1630_s21 }
  0x2a   :  { %1406 = vrot.lane.b32.xlu0 %v1400_v6, %s1631_s22 }
  0x2d   :  { %207 = vrot.lane.b32.xlu1 %v1697_v2, %s1630_s21 }
  0x2e   :  { %182 = vrot.lane.b32.xlu0 %v1697_v2, %s1631_s22 }
  0x31   :  { %1421 = vrot.lane.b32.xlu1 %v1420_v9, %s1626_s0 }
  0x32   :  { %1416 = vrot.lane.b32.xlu0 %v1420_v9, %s1625_s17 }
  0x35   :  { %1431 = vrot.lane.b32.xlu1 %v1420_v9, %s1627_s18 }
  0x36   :  { %1426 = vrot.lane.b32.xlu0 %v1420_v9, %s1628_s19 }
  0x39   :  { %236 = vrot.lane.b32.xlu1 %v1693_v0, %s1633_s23 }
  0x3a   :  { %234 = vrot.lane.b32.xlu0 %v1701_v4, %s1633_s23 }
  0x3d   :  { %1436 = vrot.lane.b32.xlu1 %v1420_v9, %s1629_s20 }
  0x3e   :  { %232 = vrot.lane.b32.xlu0 %v1697_v2, %s1633_s23 }
  0x41   :  { %1441 = vrot.lane.b32.xlu1 %v1420_v9, %s1631_s22 }
  0x42   :  { %167 = vrot.lane.b32.xlu0 %v1695_v1, %s1629_s20 }
  0x45   :  { %192 = vrot.lane.b32.xlu1 %v1695_v1, %s1631_s22 }
  0x46   :  { %1446 = vrot.lane.b32.xlu0 %v1420_v9, %s1630_s21 }
  0x49   :  { %238 = vrot.lane.b32.xlu1 %v1720_v7, %s1633_s23 }
  0x4a   :  { %217 = vrot.lane.b32.xlu0 %v1695_v1, %s1630_s21 }
  0x4d   :  { %242 = vrot.lane.b32.xlu1 %v1695_v1, %s1633_s23 }
  0x4e   :  { %240 = vrot.lane.b32.xlu0 %v1722_v8, %s1633_s23 }
  0x87   :  { %v1757_v12 = vpop.permute.xlu1 %1371 }
  0x88   :  { %v1759_v13 = vpop.permute.xlu0 %1361  ;;  %v1373_v15 = vunpack.i.l.bf16 %v1757_v12  ;;  %v1374_v9 = vunpack.i.h.bf16 %v1757_v12 }
  0x89   :  { %v1364_v16 = vunpack.i.h.bf16 %v1759_v13  ;;  %v1363_v17 = vunpack.i.l.bf16 %v1759_v13 }
  0x8b   :  { %v1767_v18 = vpop.permute.xlu1 %1376  ;;  %v68_v24 = vsel %vm63_vm0, %v1363_v17, %v1364_v16  ;;  %v69_v26 = vsel %vm63_vm0, %v1373_v15, %v1363_v17 }
  0x8c   :  { %v1378_v19 = vunpack.i.l.bf16 %v1767_v18  ;;  %v1770_v20 = vpop.permute.xlu0 %1366 }
  0x8d   :  { %v1369_v21 = vunpack.i.h.bf16 %v1770_v20  ;;  %v1368_v22 = vunpack.i.l.bf16 %v1770_v20 }
  0x8f   :  { %v1778_v23 = vpop.permute.xlu1 %1386  ;;  %v93_v25 = vsel %vm88_vm1, %v1368_v22, %v1369_v21  ;;  %v94_v27 = vsel %vm88_vm1, %v1378_v19, %v1368_v22 }
  0x90   :  { %v1389_v28 = vunpack.i.h.bf16 %v1778_v23  ;;  %v1388_v29 = vunpack.i.l.bf16 %v1778_v23  ;;  %v1798_v30 = vpop.permute.xlu0 %1381  ;;  %v1252_v31 = vpack.c.bf16 %v93_v25, %v68_v24  ;;  %v1254_v32 = vpack.c.bf16 %v94_v27, %v69_v26 }
  0x91   :  { %v1384_v33 = vunpack.i.h.bf16 %v1798_v30  ;;  %v1383_v34 = vunpack.i.l.bf16 %v1798_v30 }
  0x92   :  { %1253 = vmatprep.subr.bf16.mxu0 %v1252_v31  ;;  %v143_v35 = vsel %vm138_vm3, %v1388_v29, %v1389_v28 }
  0x93   :  { %1255 = vmatpush1.bf16.msra.mxu0 %v1254_v32  ;;  %v1806_v36 = vpop.permute.xlu1 %1396  ;;  %v118_v37 = vsel %vm113_vm2, %v1383_v34, %v1384_v33 }
  0x94   :  { %v1398_v38 = vunpack.i.l.bf16 %v1806_v36  ;;  %v1813_v39 = vpop.permute.xlu0 %1391  ;;  %v1256_v40 = vpack.c.bf16 %v143_v35, %v118_v37  ;;  %v1399_v25 = vunpack.i.h.bf16 %v1806_v36 }
  0x95   :  { %v1393_v41 = vunpack.i.l.bf16 %v1813_v39  ;;  %v1394_v26 = vunpack.i.h.bf16 %v1813_v39 }
  0x96   :  { %1257 = vmatprep.subr.bf16.mxu0 %v1256_v40  ;;  %v144_v42 = vsel %vm138_vm3, %v1398_v38, %v1388_v29  ;;  %v67_v40 = vsel %vm63_vm0, %v1364_v16, %v1374_v9  ;;  %v142_v13 = vsel %vm138_vm3, %v1389_v28, %v1399_v25 }
  0x97   :  { %v1820_v43 = vpop.permute.xlu1 %157  ;;  %v119_v44 = vsel %vm113_vm2, %v1393_v41, %v1383_v34 }
  0x98   :  { %v1826_v45 = vpop.permute.xlu0 %1401  ;;  %v1258_v46 = vpack.c.bf16 %v144_v42, %v119_v44 }
  0x99   :  { %v1404_v47 = vunpack.i.h.bf16 %v1826_v45  ;;  %v1403_v48 = vunpack.i.l.bf16 %v1826_v45 }
  0x9a   :  { %1259 = vmatpush1.bf16.msra.mxu0 %v1258_v46 }
  0x9b   :  { %v1831_v49 = vpop.permute.xlu1 %1411  ;;  %v173_v50 = vsel %vm169_vm4, %v1403_v48, %v1404_v47  ;;  %v174_v51 = vsel %vm169_vm4, %v1820_v43, %v1403_v48  ;;  %v117_v48 = vsel %vm113_vm2, %v1384_v33, %v1394_v26 }
  0x9c   :  { %v1414_v52 = vunpack.i.h.bf16 %v1831_v49  ;;  %v1413_v53 = vunpack.i.l.bf16 %v1831_v49  ;;  %v1844_v54 = vpop.permute.xlu0 %1406  ;;  %v1260_v55 = vpack.c.bf16 %v173_v50, %v1701_v4  ;;  %v1262_v56 = vpack.c.bf16 %v174_v51, %v1697_v2 }
  0x9d   :  { %v1409_v57 = vunpack.i.h.bf16 %v1844_v54  ;;  %v1408_v58 = vunpack.i.l.bf16 %v1844_v54  ;;  %v1379_v4 = vunpack.i.h.bf16 %v1767_v18  ;;  %v1274_v33 = vpack.c.bf16 %v142_v13, %v117_v48 }
  0x9e   :  { %1261 = vmatprep.subr.bf16.mxu0 %v1260_v55  ;;  %v223_v59 = vsel %vm219_vm5, %v1413_v53, %v1414_v52 }
  0x9f   :  { %1263 = vmatpush1.bf16.msra.mxu0 %v1262_v56  ;;  %v1854_v60 = vpop.permute.xlu1 %207  ;;  %v198_v61 = vsel %vm194_vm6, %v1408_v58, %v1409_v57  ;;  %v92_v29 = vsel %vm88_vm1, %v1369_v21, %v1379_v4 }
  0xa0   :  { %v224_v62 = vsel %vm219_vm5, %v1854_v60, %v1413_v53  ;;  %v1863_v63 = vpop.permute.xlu0 %182  ;;  %v1264_v2 = vpack.c.bf16 %v223_v59, %v198_v61  ;;  %v1270_v46 = vpack.c.bf16 %v92_v29, %v67_v40 }
  0xa1   :  { %v199_v3 = vsel %vm194_vm6, %v1863_v63, %v1408_v58 }
  0xa2   :  { %v1266_v5 = vpack.c.bf16 %v224_v62, %v199_v3  ;;  %1265 = vmatprep.subr.bf16.mxu0 %v1264_v2 }
  0xa3   :  { %v1422_v6 = vpop.permute.xlu1 %1421 }
  0xa4   :  { %v1423_v17 = vunpack.i.l.bf16 %v1422_v6  ;;  %v1417_v22 = vpop.permute.xlu0 %1416  ;;  %1267 = vmatpush1.bf16.msra.mxu0 %v1266_v5  ;;  %v1424_v42 = vunpack.i.h.bf16 %v1422_v6 }
  0xa5   :  { %v1418_v24 = vunpack.i.l.bf16 %v1417_v22  ;;  %v1419_v20 = vunpack.i.h.bf16 %v1417_v22 }
  0xa6   :  { %v91_v27 = vsel %vm88_vm1, %v1379_v4, %v1423_v17  ;;  %v90_v30 = vsel %vm88_vm1, %v1423_v17, %v1424_v42  ;;  %v89_v59 = vsel %vm88_vm1, %v1424_v42, %v1378_v19  ;;  %v1917_v4 = vld [vmem:[%s2336_s2] sm:$0xff] }
  0xa7   :  { %v1432_v31 = vpop.permute.xlu1 %1431  ;;  %v66_v32 = vsel %vm63_vm0, %v1374_v9, %v1418_v24  ;;  %v65_v28 = vsel %vm63_vm0, %v1418_v24, %v1419_v20  ;;  %v64_v58 = vsel %vm63_vm0, %v1419_v20, %v1373_v15 }
  0xa8   :  { %v1433_v34 = vunpack.i.l.bf16 %v1432_v31  ;;  %v1427_v35 = vpop.permute.xlu0 %1426  ;;  %v1268_v37 = vpack.c.bf16 %v91_v27, %v66_v32  ;;  %v1434_v51 = vunpack.i.h.bf16 %v1432_v31  ;;  %v1286_v18 = vpack.c.bf16 %v90_v30, %v65_v28 }
  0xa9   :  { %v1428_v44 = vunpack.i.l.bf16 %v1427_v35  ;;  %v1429_v53 = vunpack.i.h.bf16 %v1427_v35  ;;  %v1284_v5 = vpack.c.bf16 %v89_v59, %v64_v58 }
  0xaa   :  { %1269 = vmatprep.subr.bf16.mxu1 %v1268_v37  ;;  %v141_v21 = vsel %vm138_vm3, %v1399_v25, %v1433_v34  ;;  %v139_v15 = vsel %vm138_vm3, %v1434_v51, %v1398_v38  ;;  %v140_v6 = vsel %vm138_vm3, %v1433_v34, %v1434_v51  ;;  %v531_v51 = vshrl.u32 %v61_v11, 7 }
  0xab   :  { %1271 = vmatpush1.bf16.msra.mxu1 %v1270_v46  ;;  %v1895_v16 = vpop.permute.xlu1 %236  ;;  %v116_v50 = vsel %vm113_vm2, %v1394_v26, %v1428_v44  ;;  %v114_v12 = vsel %vm113_vm2, %v1429_v53, %v1393_v41  ;;  %v115_v9 = vsel %vm113_vm2, %v1428_v44, %v1429_v53 }
  0xac   :  { %v235_v55 = vpop.permute.xlu0 %234  ;;  %v1272_v56 = vpack.c.bf16 %v141_v21, %v116_v50  ;;  %v1288_v41 = vpack.c.bf16 %v139_v15, %v114_v12  ;;  %v532_v53 = vsub.s32 0, %v531_v51  ;;  %v552_v15 = vsub.s32 5, %v531_v51 }
  0xad   :  { %v248_v23 = vsel %vm244_vm7, %v235_v55, %v1895_v16 }
  0xae   :  { %332 = vmatprep.subr.mxu0 %v248_v23  ;;  %1273 = vmatprep.subr.bf16.mxu1 %v1272_v56 }
  0xaf   :  { %1275 = vmatpush1.bf16.msra.mxu1 %v1274_v33  ;;  %v1437_v61 = vpop.permute.xlu1 %1436 }
  0xb0   :  { %v1439_v62 = vunpack.i.h.bf16 %v1437_v61  ;;  %v1438_v2 = vunpack.i.l.bf16 %v1437_v61  ;;  %v233_v3 = vpop.permute.xlu0 %232 }
  0xb1   :  { %v249_v19 = vsel %vm244_vm7, %v233_v3, %v235_v55  ;;  %v536_v55 = vsub.s32 1, %v531_v51 }
  0xb2   :  { %333 = vmatpush1.msra.mxu0 %v249_v19  ;;  %v171_v39 = vsel %vm169_vm4, %v1438_v2, %v1439_v62  ;;  %v172_v36 = vsel %vm169_vm4, %v1404_v47, %v1438_v2  ;;  %v1290_v47 = vpack.c.bf16 %v140_v6, %v115_v9  ;;  %v540_v2 = vsub.s32 2, %v531_v51 }
  0xb3   :  { %1285 = vmatprep.subr.bf16.mxu0 %v1284_v5  ;;  %v1442_v38 = vpop.permute.xlu1 %1441  ;;  %1246 = vmatmul.mubr.msk.f32.vlgmr.msra.gmra.mrb[0].mxu0 %vm312_vm8, %v1917_v4  ;;  %v1276_v17 = vpack.c.bf16 %v171_v39, %v1720_v7  ;;  %v1278_v22 = vpack.c.bf16 %v172_v36, %v1693_v0 }
  0xb4   :  { %v168_v24 = vpop.permute.xlu0 %167  ;;  %1287 = vmatpush1.bf16.msra.mxu0 %v1286_v18  ;;  %522 = vmatprep.mubr.f32.mxu0 %v1632_v10  ;;  %v1444_v25 = vunpack.i.h.bf16 %v1442_v38  ;;  %v1443_v27 = vunpack.i.l.bf16 %v1442_v38 }
  0xb5   :  { %v175_v45 = vsel %vm169_vm4, %v168_v24, %v1820_v43  ;;  %1289 = vmatprep.subr.bf16.mxu0 %v1288_v41  ;;  %1277 = vmatprep.subr.bf16.mxu1 %v1276_v17  ;;  %v170_v7 = vsel %vm169_vm4, %v1439_v62, %v168_v24 }
  0xb6   :  { %v1292_v26 = vpack.c.bf16 %v175_v45, %v1695_v1  ;;  %1279 = vmatpush1.bf16.msra.mxu1 %v1278_v22  ;;  %v196_v34 = vsel %vm194_vm6, %v1443_v27, %v1444_v25  ;;  %v1294_v43 = vpack.c.bf16 %v170_v7, %v1722_v8  ;;  %v197_v37 = vsel %vm194_vm6, %v1409_v57, %v1443_v27 }
  0xb7   :  { %v193_v0 = vpop.permute.xlu1 %192 }
  0xb8   :  { %v1447_v29 = vpop.permute.xlu0 %1446  ;;  %1291 = vmatpush1.bf16.msra.mxu0 %v1290_v47  ;;  %v195_v8 = vsel %vm194_vm6, %v1444_v25, %v193_v0  ;;  %v200_v20 = vsel %vm194_vm6, %v193_v0, %v1863_v63 }
  0xb9   :  { %v1449_v31 = vunpack.i.h.bf16 %v1447_v29  ;;  %v1448_v32 = vunpack.i.l.bf16 %v1447_v29  ;;  %1293 = vmatprep.subr.bf16.mxu0 %v1292_v26 }
  0xbb   :  { %v239_v35 = vpop.permute.xlu1 %238  ;;  %v221_v1 = vsel %vm219_vm5, %v1448_v32, %v1449_v31  ;;  %v222_v40 = vsel %vm219_vm5, %v1414_v52, %v1448_v32 }
  0xbc   :  { %v218_v42 = vpop.permute.xlu0 %217  ;;  %1295 = vmatpush1.bf16.msra.mxu0 %v1294_v43  ;;  %v1280_v44 = vpack.c.bf16 %v221_v1, %v196_v34  ;;  %v1282_v46 = vpack.c.bf16 %v222_v40, %v197_v37  ;;  %v1634_v43 = vmov 0  }
  0xbd   :  { %v220_v54 = vsel %vm219_vm5, %v1449_v31, %v218_v42  ;;  %v225_v49 = vsel %vm219_vm5, %v218_v42, %v1854_v60  ;;  %v247_v60 = vsel %vm244_vm7, %v1895_v16, %v239_v35  ;;  %v42_v16 = vld [vmem:[%s2335_s1] sm:$0x3f]  ;;  %1450 = vset.pattern.permute.xlu0 %v1634_v43  ;;  %1451 = vset.pattern.permute.xlu1 %v1634_v43 }
  0xbe   :  { %v1296_v57 = vpack.c.bf16 %v225_v49, %v200_v20  ;;  %v1298_v52 = vpack.c.bf16 %v220_v54, %v195_v8  ;;  %1281 = vmatprep.subr.bf16.mxu1 %v1280_v44  ;;  %v1992_v56 = vrot.slane %v42_v16, %v532_v53  ;;  %v1994_v30 = vrot.slane %v42_v16, %v536_v55  ;;  %v592_v8 = vld [vmem:[%s2337_s3] sm:$0xff] }
  0xbf   :  { %1283 = vmatpush1.bf16.msra.mxu1 %v1282_v46  ;;  %v243_v21 = vpop.permute.xlu1 %242  ;;  %v1998_v12 = vrot.slane %v42_v16, %v540_v2  ;;  %v2005_v39 = vrot.slane %v42_v16, %v552_v15  ;;  %v594_v49 = vld [vmem:[%s2338_s4] sm:$0xff] }
  0xc0   :  { %v241_v48 = vpop.permute.xlu0 %240  ;;  %1297 = vmatprep.subr.bf16.mxu0 %v1296_v57  ;;  %v250_v13 = vsel %vm244_vm7, %v243_v21, %v233_v3  ;;  %v544_v3 = vsub.s32 3, %v531_v51 }
  0xc1   :  { %1299 = vmatpush1.bf16.msra.mxu0 %v1298_v52  ;;  %v246_v63 = vsel %vm244_vm7, %v239_v35, %v241_v48  ;;  %v245_v50 = vsel %vm244_vm7, %v241_v48, %v243_v21 }
  0xc2   :  { %403 = vmatprep.subr.mxu1 %v246_v63  ;;  %474 = vmatprep.subr.mxu0 %v250_v13  ;;  %v2000_v18 = vrot.slane %v42_v16, %v544_v3 }
  0xc3   :  { %404 = vmatpush1.msra.mxu1 %v247_v60 }
  0xc4   :  { %1247 = vmatmul.mubr.msk.f32.vlgmr.msra.gmra.mrb[0].mxu1 %vm312_vm8, %v1917_v4 }
  0xc5   :  { %475 = vmatpush1.msra.mxu0 %v245_v50  ;;  %975 = vmatprep.mubr.f32.mxu1 %v1632_v10 }
  0xc6   :  { %1248 = vmatmul.mubr.msk.f32.vlgmr.msra.gmra.mrb[2].mxu0 %vm312_vm8, %v1917_v4  ;;  %v548_v4 = vsub.s32 4, %v531_v51 }
  0xc7   :  { %1046 = vmatprep.mubr.f32.mxu0 %v1632_v10 }
  0xc8   :  { %v2002_v19 = vrot.slane %v42_v16, %v548_v4 }
 0x186   :  { %v382_v23 = vpop.f32.mrb[0].mxu0 }
 0x187   :  { %v560_v33 = vmul.f32 %v1992_v56, %v382_v23  ;;  %v384_v28 = vpop.f32.mrb[1].mxu0 }
 0x188   :  { %v561_v58 = vmul.f32 %v1994_v30, %v384_v28 }
 0x189   :  { %v573_v59 = vmul.f32 %v560_v33, %v382_v23 }
 0x18a   :  { %v566_v61 = vadd.f32 %v561_v58, %v560_v33  ;;  %v574_v62 = vmul.f32 %v561_v58, %v384_v28 }
 0x18c   :  { %v579_v11 = vadd.f32 %v574_v62, %v573_v59 }
 0x197   :  { %v453_v5 = vpop.f32.mrb[0].mxu1 }
 0x198   :  { %v562_v6 = vmul.f32 %v1998_v12, %v453_v5  ;;  %v455_v9 = vpop.f32.mrb[1].mxu1 }
 0x199   :  { %v563_v36 = vmul.f32 %v2000_v18, %v455_v9  ;;  %v524_v38 = vpop.f32.mrb[2].mxu0 }
 0x19a   :  { %v567_v41 = vadd.f32 %v566_v61, %v562_v6  ;;  %v575_v17 = vmul.f32 %v562_v6, %v453_v5  ;;  %v564_v22 = vmul.f32 %v2002_v19, %v524_v38  ;;  %v526_v24 = vpop.f32.mrb[3].mxu0 }
 0x19b   :  { %v576_v25 = vmul.f32 %v563_v36, %v455_v9  ;;  %v565_v47 = vmul.f32 %v2005_v39, %v526_v24 }
 0x19c   :  { %v580_v45 = vadd.f32 %v579_v11, %v575_v17  ;;  %v568_v26 = vadd.f32 %v567_v41, %v563_v36  ;;  %v577_v27 = vmul.f32 %v564_v22, %v524_v38 }
 0x19d   :  { %v578_v31 = vmul.f32 %v565_v47, %v526_v24 }
 0x19e   :  { %v569_v7 = vadd.f32 %v568_v26, %v564_v22  ;;  %v581_v0 = vadd.f32 %v580_v45, %v576_v25 }
 0x1a0   :  { %v570_v29 = vadd.f32 %v569_v7, %v565_v47  ;;  %v582_v32 = vadd.f32 %v581_v0, %v577_v27 }
 0x1a2   :  { %571 = vadd.xlane.f32.xlu0 %v570_v29  ;;  %v583_v34 = vadd.f32 %v582_v32, %v578_v31 }
 0x1a4   :  { %584 = vadd.xlane.f32.xlu1 %v583_v34 }
 0x22f   :  { %v572_v35 = vpop.xlane.xlu0 %571 }
 0x230   :  { %v586_v1 = vmul.f32 0.001953125, %v572_v35 }
 0x231   :  { %v585_v37 = vpop.xlane.xlu1 %584 }
 0x232   :  { %v588_v40 = vmul.f32 %v586_v1, %v586_v1  ;;  %v587_v42 = vmul.f32 0.001953125, %v585_v37 }
 0x234   :  { %v589_v44 = vsub.f32 %v587_v42, %v588_v40 }
 0x236   :  { %v590_v46 = vadd.f32 1e-05, %v589_v44 }
 0x238   :  { %1542 = vrsqrt.f32 %v590_v46 }
 0x242   :  { %v1543_v20 = vpop.eup %1542 }
 0x243   :  { %v593_v54 = vmul.f32 %v1543_v20, %v592_v8 }
 0x245   :  { %599 = vperm.xlu0 %1450, %v593_v54   ;;  %v595_v57 = vmul.f32 %v593_v54, %v586_v1 }
 0x247   :  { %v596_v52 = vsub.f32 %v594_v49, %v595_v57 }
 0x249   :  { %610 = vperm.xlu1 %1451, %v596_v52  }
 0x2c4   :  { %v600_v21 = vpop.permute.xlu0 %599 }
 0x2c5   :  { %v602_v48 = vmul.f32 %v600_v21, %v382_v23  ;;  %v603_v13 = vmul.f32 %v600_v21, %v384_v28  ;;  %v604_v63 = vmul.f32 %v600_v21, %v453_v5  ;;  %v607_v50 = vmul.f32 %v600_v21, %v526_v24 }
 0x2c6   :  { %v605_v62 = vmul.f32 %v600_v21, %v455_v9  ;;  %v606_v11 = vmul.f32 %v600_v21, %v524_v38 }
 0x2c8   :  { %v611_v60 = vpop.permute.xlu1 %610 }
 0x2c9   :  { %v613_v51 = vadd.f32 %v611_v60, %v602_v48  ;;  %v614_v53 = vadd.f32 %v611_v60, %v603_v13  ;;  %v615_v16 = vadd.f32 %v611_v60, %v604_v63  ;;  %v618_v55 = vadd.f32 %v611_v60, %v607_v50 }
 0x2ca   :  { %v616_v2 = vadd.f32 %v611_v60, %v605_v62  ;;  %v617_v3 = vadd.f32 %v611_v60, %v606_v11 }
 0x2cb   :  { %v625_v33 = vmul.f32 0.70710677, %v613_v51  ;;  %v626_v58 = vmul.f32 0.70710677, %v614_v53  ;;  %v627_v59 = vmul.f32 0.70710677, %v615_v16 }
 0x2cc   :  { %v630_v61 = vmul.f32 0.70710677, %v618_v55  ;;  %v628_v23 = vmul.f32 0.70710677, %v616_v2  ;;  %v629_v28 = vmul.f32 0.70710677, %v617_v3 }
 0x2cd   :  { %1544 = verf.f32 %v625_v33  ;;  %v619_v5 = vmul.f32 0.5, %v613_v51  ;;  %v620_v41 = vmul.f32 0.5, %v614_v53  ;;  %v621_v22 = vmul.f32 0.5, %v615_v16 }
 0x2ce   :  { %1546 = verf.f32 %v626_v58  ;;  %v624_v26 = vmul.f32 0.5, %v618_v55  ;;  %v622_v42 = vmul.f32 0.5, %v616_v2  ;;  %v623_v44 = vmul.f32 0.5, %v617_v3 }
 0x2cf   :  { %1548 = verf.f32 %v627_v59 }
 0x2d0   :  { %1550 = verf.f32 %v630_v61 }
 0x2d1   :  { %1552 = verf.f32 %v628_v23 }
 0x2d2   :  { %1554 = verf.f32 %v629_v28 }
 0x2d7   :  { %v1545_v4 = vpop.eup %1544 }
 0x2d8   :  { %v1547_v15 = vpop.eup %1546  ;;  %v637_v6 = vadd.f32 1.0, %v1545_v4 }
 0x2d9   :  { %v1549_v36 = vpop.eup %1548  ;;  %v638_v17 = vadd.f32 1.0, %v1547_v15 }
 0x2da   :  { %v639_v24 = vadd.f32 1.0, %v1549_v36  ;;  %v643_v25 = vmul.f32 %v637_v6, %v619_v5  ;;  %v1551_v45 = vpop.eup %1550 }
 0x2db   :  { %v644_v9 = vmul.f32 %v638_v17, %v620_v41  ;;  %v642_v27 = vadd.f32 1.0, %v1551_v45  ;;  %v1553_v34 = vpop.eup %1552 }
 0x2dc   :  { %v645_v38 = vmul.f32 %v639_v24, %v621_v22  ;;  %v2017_v47 = vmul.f32 %v643_v25, %v1992_v56  ;;  %v1555_v35 = vpop.eup %1554  ;;  %v640_v1 = vadd.f32 1.0, %v1553_v34 }
 0x2dd   :  { %v2020_v7 = vmul.f32 %v644_v9, %v1994_v30  ;;  %v648_v0 = vmul.f32 %v642_v27, %v624_v26  ;;  %v641_v37 = vadd.f32 1.0, %v1555_v35 }
 0x2de   :  { %v2023_v29 = vmul.f32 %v645_v38, %v1998_v12  ;;  %v646_v46 = vmul.f32 %v640_v1, %v622_v42 }
 0x2df   :  { %v1452_v31 = vpack.i.bf16 %v2020_v7, %v2017_v47  ;;  %v2028_v32 = vmul.f32 %v648_v0, %v2005_v39  ;;  %v647_v8 = vmul.f32 %v641_v37, %v623_v44 }
 0x2e0   :  { %v1492_v40 = vpack.i.bf16 %v2023_v29, %v2020_v7  ;;  %v2042_v20 = vmul.f32 %v646_v46, %v2000_v18 }
 0x2e1   :  { %1453 = vrot.lane.b32.xlu1 %v1452_v31, %s1625_s17  ;;  %v1482_v43 = vpack.i.bf16 %v2023_v29, %v2028_v32  ;;  %v2045_v54 = vmul.f32 %v647_v8, %v2002_v19 }
 0x2e3   :  { %1483 = vrot.lane.b32.xlu0 %v1482_v43, %s1628_s19  ;;  %v1507_v49 = vpack.i.bf16 %v2045_v54, %v2042_v20 }
 0x2e5   :  { %1458 = vrot.lane.b32.xlu1 %v1452_v31, %s1626_s0 }
 0x2e7   :  { %1493 = vrot.lane.b32.xlu0 %v1492_v40, %s1629_s20 }
 0x2e9   :  { %1463 = vrot.lane.b32.xlu1 %v1482_v43, %s1625_s17 }
 0x2eb   :  { %1498 = vrot.lane.b32.xlu0 %v1492_v40, %s1631_s22 }
 0x2ed   :  { %1468 = vrot.lane.b32.xlu1 %v1482_v43, %s1626_s0 }
 0x2ef   :  { %781 = vrot.lane.b32.xlu0 %v2017_v47, %s1631_s22 }
 0x2f1   :  { %1473 = vrot.lane.b32.xlu1 %v1452_v31, %s1628_s19 }
 0x2f3   :  { %1508 = vrot.lane.b32.xlu0 %v1507_v49, %s1625_s17 }
 0x2f5   :  { %1478 = vrot.lane.b32.xlu1 %v1452_v31, %s1627_s18 }
 0x2f7   :  { %1518 = vrot.lane.b32.xlu0 %v1507_v49, %s1628_s19 }
 0x2f9   :  { %1488 = vrot.lane.b32.xlu1 %v1482_v43, %s1627_s18 }
 0x2fb   :  { %831 = vrot.lane.b32.xlu0 %v2020_v7, %s1633_s23 }
 0x2fd   :  { %757 = vrot.lane.b32.xlu1 %v2017_v47, %s1629_s20 }
 0x2ff   :  { %829 = vrot.lane.b32.xlu0 %v2017_v47, %s1633_s23 }
 0x301   :  { %1503 = vrot.lane.b32.xlu1 %v1492_v40, %s1630_s21 }
 0x303   :  { %767 = vrot.lane.b32.xlu0 %v2028_v32, %s1629_s20 }
 0x305   :  { %805 = vrot.lane.b32.xlu1 %v2017_v47, %s1630_s21 }
 0x307   :  { %1538 = vrot.lane.b32.xlu0 %v1507_v49, %s1630_s21 }
 0x309   :  { %1513 = vrot.lane.b32.xlu1 %v1507_v49, %s1626_s0 }
 0x30b   :  { %815 = vrot.lane.b32.xlu0 %v2028_v32, %s1630_s21 }
 0x30d   :  { %1523 = vrot.lane.b32.xlu1 %v1507_v49, %s1627_s18 }
 0x30f   :  { %837 = vrot.lane.b32.xlu0 %v2045_v54, %s1633_s23 }
 0x311   :  { %833 = vrot.lane.b32.xlu1 %v2023_v29, %s1633_s23 }
 0x315   :  { %1528 = vrot.lane.b32.xlu1 %v1507_v49, %s1629_s20 }
 0x319   :  { %1533 = vrot.lane.b32.xlu1 %v1507_v49, %s1631_s22 }
 0x31d   :  { %791 = vrot.lane.b32.xlu1 %v2028_v32, %s1631_s22 }
 0x321   :  { %835 = vrot.lane.b32.xlu1 %v2042_v20, %s1633_s23 }
 0x325   :  { %839 = vrot.lane.b32.xlu1 %v2028_v32, %s1633_s23 }
 0x353   :  { %v2084_v57 = vpop.permute.xlu1 %1453 }
 0x354   :  { %v1456_v52 = vunpack.i.h.bf16 %v2084_v57  ;;  %v1455_v21 = vunpack.i.l.bf16 %v2084_v57 }
 0x355   :  { %v2088_v48 = vpop.permute.xlu0 %1483 }
 0x356   :  { %v671_v50 = vsel %vm63_vm0, %v1455_v21, %v1456_v52  ;;  %v1485_v45 = vunpack.i.l.bf16 %v2088_v48 }
 0x357   :  { %v2090_v13 = vpop.permute.xlu1 %1458 }
 0x358   :  { %v1461_v63 = vunpack.i.h.bf16 %v2090_v13  ;;  %v1460_v60 = vunpack.i.l.bf16 %v2090_v13 }
 0x359   :  { %v2102_v53 = vpop.permute.xlu0 %1493 }
 0x35a   :  { %v695_v51 = vsel %vm88_vm1, %v1460_v60, %v1461_v63  ;;  %v1496_v41 = vunpack.i.h.bf16 %v2102_v53  ;;  %v1495_v17 = vunpack.i.l.bf16 %v2102_v53 }
 0x35b   :  { %v2104_v16 = vpop.permute.xlu1 %1463  ;;  %v1300_v55 = vpack.c.bf16 %v695_v51, %v671_v50 }
 0x35c   :  { %v1465_v33 = vunpack.i.l.bf16 %v2104_v16  ;;  %v772_v26 = vsel %vm169_vm4, %v1495_v17, %v1496_v41 }
 0x35d   :  { %1301 = vmatprep.subr.bf16.mxu1 %v1300_v55  ;;  %v2107_v58 = vpop.permute.xlu0 %1498  ;;  %v1308_v1 = vpack.c.bf16 %v772_v26, %v2020_v7 }
 0x35e   :  { %v672_v62 = vsel %vm63_vm0, %v1465_v33, %v1455_v21  ;;  %v1501_v37 = vunpack.i.h.bf16 %v2107_v58  ;;  %v1500_v40 = vunpack.i.l.bf16 %v2107_v58 }
 0x35f   :  { %v2109_v59 = vpop.permute.xlu1 %1468 }
 0x360   :  { %v1470_v61 = vunpack.i.l.bf16 %v2109_v59  ;;  %v796_v7 = vsel %vm194_vm6, %v1500_v40, %v1501_v37  ;;  %v1471_v55 = vunpack.i.h.bf16 %v2109_v59  ;;  %v2233_v59 = vld [vmem:[%s2339_s5] sm:$0xff] }
 0x361   :  { %v2120_v2 = vpop.permute.xlu0 %781 }
 0x362   :  { %v696_v11 = vsel %vm88_vm1, %v1470_v61, %v1460_v60  ;;  %v797_v50 = vsel %vm194_vm6, %v2120_v2, %v1500_v40 }
 0x363   :  { %v1302_v3 = vpack.c.bf16 %v696_v11, %v672_v62  ;;  %v2122_v23 = vpop.permute.xlu1 %1473 }
 0x364   :  { %v1476_v28 = vunpack.i.h.bf16 %v2122_v23  ;;  %v1475_v4 = vunpack.i.l.bf16 %v2122_v23 }
 0x365   :  { %1303 = vmatpush1.bf16.msra.mxu1 %v1302_v3  ;;  %v2128_v5 = vpop.permute.xlu0 %1508 }
 0x366   :  { %v719_v22 = vsel %vm113_vm2, %v1475_v4, %v1476_v28  ;;  %v720_v27 = vsel %vm113_vm2, %v1485_v45, %v1475_v4  ;;  %v1510_v11 = vunpack.i.l.bf16 %v2128_v5  ;;  %v1466_v4 = vunpack.i.h.bf16 %v2104_v16 }
 0x367   :  { %v2126_v15 = vpop.permute.xlu1 %1478 }
 0x368   :  { %v1481_v6 = vunpack.i.h.bf16 %v2126_v15  ;;  %v1480_v36 = vunpack.i.l.bf16 %v2126_v15  ;;  %v669_v26 = vsel %vm63_vm0, %v1466_v4, %v1510_v11  ;;  %v670_v13 = vsel %vm63_vm0, %v1456_v52, %v1466_v4 }
 0x369   :  { %v2152_v0 = vpop.permute.xlu0 %1518 }
 0x36a   :  { %v743_v24 = vsel %vm138_vm3, %v1480_v36, %v1481_v6 }
 0x36b   :  { %v2140_v25 = vpop.permute.xlu1 %1488  ;;  %v1304_v9 = vpack.c.bf16 %v743_v24, %v719_v22  ;;  %v1520_v24 = vunpack.i.l.bf16 %v2152_v0 }
 0x36c   :  { %v1490_v38 = vunpack.i.l.bf16 %v2140_v25  ;;  %v1491_v22 = vunpack.i.h.bf16 %v2140_v25 }
 0x36d   :  { %1305 = vmatprep.subr.bf16.mxu1 %v1304_v9  ;;  %v832_v46 = vpop.permute.xlu0 %831 }
 0x36e   :  { %v744_v31 = vsel %vm138_vm3, %v1490_v38, %v1480_v36 }
 0x36f   :  { %v1306_v34 = vpack.c.bf16 %v744_v31, %v720_v27  ;;  %v2158_v43 = vpop.permute.xlu1 %757  ;;  %v1486_v31 = vunpack.i.h.bf16 %v2088_v48 }
 0x370   :  { %v773_v35 = vsel %vm169_vm4, %v2158_v43, %v1495_v17  ;;  %v694_v17 = vsel %vm88_vm1, %v1461_v63, %v1471_v55 }
 0x371   :  { %1307 = vmatpush1.bf16.msra.mxu1 %v1306_v34  ;;  %v1310_v42 = vpack.c.bf16 %v773_v35, %v2017_v47  ;;  %v2189_v3 = vpop.permute.xlu0 %829  ;;  %v1318_v35 = vpack.c.bf16 %v694_v17, %v670_v13  ;;  %v717_v57 = vsel %vm113_vm2, %v1486_v31, %v1520_v24 }
 0x372   :  { %1309 = vmatprep.subr.bf16.mxu1 %v1308_v1  ;;  %v1511_v1 = vunpack.i.h.bf16 %v2128_v5 }
 0x373   :  { %v2167_v44 = vpop.permute.xlu1 %1503 }
 0x374   :  { %v1506_v8 = vunpack.i.h.bf16 %v2167_v44  ;;  %v1505_v49 = vunpack.i.l.bf16 %v2167_v44 }
 0x375   :  { %1311 = vmatpush1.bf16.msra.mxu1 %v1310_v42  ;;  %v768_v40 = vpop.permute.xlu0 %767 }
 0x376   :  { %v820_v21 = vsel %vm219_vm5, %v1505_v49, %v1506_v8 }
 0x377   :  { %v2179_v60 = vpop.permute.xlu1 %805  ;;  %v1312_v47 = vpack.c.bf16 %v820_v21, %v796_v7  ;;  %v742_v7 = vsel %vm138_vm3, %v1481_v6, %v1491_v22  ;;  %v1521_v21 = vunpack.i.h.bf16 %v2152_v0  ;;  %v718_v6 = vsel %vm113_vm2, %v1476_v28, %v1486_v31 }
 0x378   :  { %v821_v51 = vsel %vm219_vm5, %v2179_v60, %v1505_v49  ;;  %v668_v28 = vsel %vm63_vm0, %v1510_v11, %v1511_v1  ;;  %v774_v11 = vsel %vm169_vm4, %v768_v40, %v2158_v43 }
 0x379   :  { %v1314_v62 = vpack.c.bf16 %v821_v51, %v797_v50  ;;  %1313 = vmatprep.subr.bf16.mxu1 %v1312_v47  ;;  %v1322_v51 = vpack.c.bf16 %v742_v7, %v718_v6  ;;  %v716_v48 = vsel %vm113_vm2, %v1520_v24, %v1521_v21 }
 0x37b   :  { %v1514_v15 = vpop.permute.xlu1 %1513  ;;  %1315 = vmatpush1.bf16.msra.mxu1 %v1314_v62  ;;  %v845_v62 = vsel %vm244_vm7, %v2189_v3, %v832_v46 }
 0x37c   :  { %v1515_v36 = vunpack.i.l.bf16 %v1514_v15  ;;  %v1516_v9 = vunpack.i.h.bf16 %v1514_v15  ;;  %v1539_v15 = vpop.permute.xlu0 %1538 }
 0x37e   :  { %v693_v27 = vsel %vm88_vm1, %v1471_v55, %v1515_v36  ;;  %v691_v5 = vsel %vm88_vm1, %v1516_v9, %v1470_v61  ;;  %v692_v0 = vsel %vm88_vm1, %v1515_v36, %v1516_v9  ;;  %v667_v61 = vsel %vm63_vm0, %v1511_v1, %v1465_v33 }
 0x37f   :  { %v1524_v34 = vpop.permute.xlu1 %1523  ;;  %v1316_v63 = vpack.c.bf16 %v693_v27, %v669_v26  ;;  %v1332_v4 = vpack.c.bf16 %v691_v5, %v667_v61  ;;  %v1334_v16 = vpack.c.bf16 %v692_v0, %v668_v28  ;;  %v715_v33 = vsel %vm113_vm2, %v1521_v21, %v1485_v45 }
 0x380   :  { %v1526_v42 = vunpack.i.h.bf16 %v1524_v34  ;;  %v1525_v49 = vunpack.i.l.bf16 %v1524_v34  ;;  %v1540_v45 = vunpack.i.l.bf16 %v1539_v15  ;;  %v1340_v27 = vpack.c.bf16 %v774_v11, %v2028_v32 }
 0x381   :  { %1317 = vmatprep.subr.bf16.mxu0 %v1316_v63 }
 0x382   :  { %1319 = vmatpush1.bf16.msra.mxu0 %v1318_v35  ;;  %v741_v52 = vsel %vm138_vm3, %v1491_v22, %v1525_v49  ;;  %v739_v23 = vsel %vm138_vm3, %v1526_v42, %v1490_v38  ;;  %v740_v25 = vsel %vm138_vm3, %v1525_v49, %v1526_v42  ;;  %v1541_v22 = vunpack.i.h.bf16 %v1539_v15 }
 0x383   :  { %v2225_v47 = vpop.permute.xlu1 %833  ;;  %v1320_v50 = vpack.c.bf16 %v741_v52, %v717_v57  ;;  %v1338_v9 = vpack.c.bf16 %v740_v25, %v716_v48  ;;  %v819_v53 = vsel %vm219_vm5, %v1506_v8, %v1540_v45 }
 0x384   :  { %v844_v55 = vsel %vm244_vm7, %v832_v46, %v2225_v47  ;;  %v1336_v46 = vpack.c.bf16 %v739_v23, %v715_v33  ;;  %v818_v44 = vsel %vm219_vm5, %v1540_v45, %v1541_v22 }
 0x385   :  { %927 = vmatprep.subr.mxu1 %v844_v55  ;;  %1321 = vmatprep.subr.bf16.mxu0 %v1320_v50 }
 0x386   :  { %928 = vmatpush1.msra.mxu1 %v845_v62  ;;  %1323 = vmatpush1.bf16.msra.mxu0 %v1322_v51 }
 0x387   :  { %v1529_v38 = vpop.permute.xlu1 %1528  ;;  %1249 = vmatmul.mubr.msk.f32.vlgmr.msra.gmra.mrb[2].mxu1 %vm312_vm8, %v2233_v59  ;;  %1333 = vmatprep.subr.bf16.mxu1 %v1332_v4 }
 0x388   :  { %v1531_v36 = vunpack.i.h.bf16 %v1529_v38  ;;  %v1530_v17 = vunpack.i.l.bf16 %v1529_v38  ;;  %1335 = vmatpush1.bf16.msra.mxu1 %v1334_v16  ;;  %1117 = vmatprep.mubr.f32.mxu1 %v1632_v10 }
 0x389   :  { %1337 = vmatprep.subr.bf16.mxu1 %v1336_v46 }
 0x38a   :  { %v771_v26 = vsel %vm169_vm4, %v1496_v41, %v1530_v17  ;;  %v770_v43 = vsel %vm169_vm4, %v1530_v17, %v1531_v36  ;;  %v769_v10 = vsel %vm169_vm4, %v1531_v36, %v768_v40  ;;  %v816_v41 = vpop.permute.xlu0 %815 }
 0x38b   :  { %v1326_v31 = vpack.c.bf16 %v771_v26, %v2023_v29  ;;  %v1534_v24 = vpop.permute.xlu1 %1533  ;;  %v1324_v13 = vpack.c.bf16 %v770_v43, %v2042_v20  ;;  %v1342_v32 = vpack.c.bf16 %v769_v10, %v2045_v54  ;;  %v817_v40 = vsel %vm219_vm5, %v1541_v22, %v816_v41 }
 0x38c   :  { %v1536_v34 = vunpack.i.h.bf16 %v1534_v24  ;;  %v1535_v63 = vunpack.i.l.bf16 %v1534_v24  ;;  %1339 = vmatpush1.bf16.msra.mxu1 %v1338_v9  ;;  %v822_v54 = vsel %vm219_vm5, %v816_v41, %v2179_v60  ;;  %v1158_v24 = vld [vmem:[%s2341_s7] sm:$0xff] }
 0x38d   :  { %1325 = vmatprep.subr.bf16.mxu0 %v1324_v13  ;;  %1341 = vmatprep.subr.bf16.mxu1 %v1340_v27 }
 0x38e   :  { %v795_v29 = vsel %vm194_vm6, %v1501_v37, %v1535_v63  ;;  %1327 = vmatpush1.bf16.msra.mxu0 %v1326_v31  ;;  %v794_v20 = vsel %vm194_vm6, %v1535_v63, %v1536_v34  ;;  %v838_v7 = vpop.permute.xlu0 %837 }
 0x38f   :  { %v1330_v35 = vpack.c.bf16 %v819_v53, %v795_v29  ;;  %v792_v1 = vpop.permute.xlu1 %791  ;;  %v1328_v8 = vpack.c.bf16 %v818_v44, %v794_v20 }
 0x390   :  { %v793_v58 = vsel %vm194_vm6, %v1536_v34, %v792_v1  ;;  %v798_v37 = vsel %vm194_vm6, %v792_v1, %v2120_v2  ;;  %1343 = vmatpush1.bf16.msra.mxu1 %v1342_v32 }
 0x391   :  { %v1344_v42 = vpack.c.bf16 %v822_v54, %v798_v37  ;;  %v1346_v49 = vpack.c.bf16 %v817_v40, %v793_v58  ;;  %1329 = vmatprep.subr.bf16.mxu0 %v1328_v8 }
 0x392   :  { %1331 = vmatpush1.bf16.msra.mxu0 %v1330_v35 }
 0x393   :  { %v836_v21 = vpop.permute.xlu1 %835  ;;  %1345 = vmatprep.subr.bf16.mxu1 %v1344_v42 }
 0x394   :  { %v843_v57 = vsel %vm244_vm7, %v2225_v47, %v836_v21  ;;  %1347 = vmatpush1.bf16.msra.mxu1 %v1346_v49  ;;  %v842_v60 = vsel %vm244_vm7, %v836_v21, %v838_v7 }
 0x395   :  { %998 = vmatprep.subr.mxu0 %v842_v60 }
 0x396   :  { %999 = vmatpush1.msra.mxu0 %v843_v57 }
 0x397   :  { %v840_v52 = vpop.permute.xlu1 %839  ;;  %1250 = vmatmul.mubr.msk.f32.vlgmr.msra.gmra.mrb[4].mxu0 %vm312_vm8, %v2233_v59 }
 0x398   :  { %v841_v2 = vsel %vm244_vm7, %v838_v7, %v840_v52  ;;  %v846_v5 = vsel %vm244_vm7, %v840_v52, %v2189_v3 }
 0x399   :  { %1069 = vmatprep.subr.mxu1 %v846_v5 }
 0x39a   :  { %1070 = vmatpush1.msra.mxu1 %v841_v2 }
 0x39b   :  { %1251 = vmatmul.mubr.msk.f32.vlgmr.msra.gmra.mrb[4].mxu1 %vm312_vm8, %v2233_v59 }
 0x45a   :  { %v977_v6 = vpop.f32.mrb[2].mxu1 }
 0x45b   :  { %v1124_v0 = vmul.f32 %v977_v6, %v1992_v56  ;;  %v979_v47 = vpop.f32.mrb[3].mxu1 }
 0x45c   :  { %v1125_v50 = vmul.f32 %v979_v47, %v1994_v30 }
 0x45d   :  { %v1137_v51 = vmul.f32 %v1124_v0, %v977_v6 }
 0x45e   :  { %v1130_v55 = vadd.f32 %v1125_v50, %v1124_v0  ;;  %v1138_v61 = vmul.f32 %v1125_v50, %v979_v47 }
 0x460   :  { %v1143_v23 = vadd.f32 %v1138_v61, %v1137_v51 }
 0x46a   :  { %v1048_v28 = vpop.f32.mrb[4].mxu0 }
 0x46b   :  { %v1126_v62 = vmul.f32 %v1048_v28, %v1998_v12  ;;  %v1050_v14 = vpop.f32.mrb[5].mxu0 }
 0x46c   :  { %v1127_v3 = vmul.f32 %v1050_v14, %v2000_v18 }
 0x46d   :  { %v1131_v4 = vadd.f32 %v1130_v55, %v1126_v62  ;;  %v1139_v15 = vmul.f32 %v1126_v62, %v1048_v28 }
 0x46e   :  { %v1140_v16 = vmul.f32 %v1127_v3, %v1050_v14  ;;  %v1119_v59 = vpop.f32.mrb[4].mxu1 }
 0x46f   :  { %v1144_v33 = vadd.f32 %v1143_v23, %v1139_v15  ;;  %v1132_v25 = vadd.f32 %v1131_v4, %v1127_v3  ;;  %v1128_v56 = vmul.f32 %v1119_v59, %v2002_v19  ;;  %v1121_v38 = vpop.f32.mrb[5].mxu1  ;;  %v1156_v19 = vld [vmem:[%s2340_s6] sm:$0xff]  ;;  %s1635_s6 = smov [#allocation6]  }
 0x470   :  { %v1129_v30 = vmul.f32 %v1121_v38, %v2005_v39  ;;  %s1237_s7 = sshll.u32 %s1635_s6, 4  ;;  %s1238_s7 = int_to_ptr.vmem [resolvable:$true] %s1237_s7 }
 0x471   :  { %v1145_v46 = vadd.f32 %v1144_v33, %v1140_v16  ;;  %v1141_v11 = vmul.f32 %v1128_v56, %v1119_v59  ;;  %v1133_v36 = vadd.f32 %v1132_v25, %v1128_v56  ;;  %v1570_v33 = vld [vmem:[#allocation3] sm:$0xff]  ;;  %s1598_s11 = scalar_lea.vmem %s1238_s7, 768  ;;  %p1603_p9 = scmp.lt.s32.totalorder %s1238_s7, %s1238_s7 }
 0x472   :  { %v1142_v17 = vmul.f32 %v1129_v30, %v1121_v38  ;;  %p1599_p8 = scmp.ne.s32.totalorder %s1238_s7, %s1598_s11  ;;  %p1604_p10 = scmp.lt.s32.totalorder %s1598_s11, %s1598_s11 }
 0x473   :  { %v1134_v48 = vadd.f32 %v1133_v36, %v1129_v30  ;;  %v1146_v12 = vadd.f32 %v1145_v46, %v1141_v11  ;;  %v1571_v46 = vld [vmem:[#allocation3 + $0x8] sm:$0xff] }
 0x474   :  { %p1605_p11 = por %p1604_p10, %p1603_p9 }
 0x475   :  { %1135 = vadd.xlane.f32.xlu0 %v1134_v48  ;;  %v1147_v45 = vadd.f32 %v1146_v12, %v1142_v17  ;;  %v1572_v17 = vld [vmem:[#allocation3 + $0x10] sm:$0xff] }
 0x476   :  { %p1606_p12 = pnand %p1605_p11, %p1599_p8 }
 0x477   :  { %1148 = vadd.xlane.f32.xlu1 %v1147_v45 }
 0x502   :  { %v1136_v18 = vpop.xlane.xlu0 %1135 }
 0x503   :  { %v1150_v22 = vmul.f32 0.001953125, %v1136_v18  ;;  %v1573_v18 = vld [vmem:[#allocation3 + $0x18] sm:$0xff] }
 0x504   :  { %v1149_v9 = vpop.xlane.xlu1 %1148 }
 0x505   :  { %v1152_v26 = vmul.f32 %v1150_v22, %v1150_v22  ;;  %v1151_v43 = vmul.f32 0.001953125, %v1149_v9 }
 0x507   :  { %v1153_v27 = vsub.f32 %v1151_v43, %v1152_v26  ;;  %v1574_v26 = vld [vmem:[#allocation3 + $0x20] sm:$0xff] }
 0x509   :  { %v1154_v10 = vadd.f32 1e-05, %v1153_v27 }
 0x50b   :  { %1556 = vrsqrt.f32 %v1154_v10  ;;  %v1575_v10 = vld [vmem:[#allocation3 + $0x28] sm:$0xff] }
 0x515   :  { %v1557_v39 = vpop.eup %1556 }
 0x516   :  { %v1157_v31 = vmul.f32 %v1557_v39, %v1156_v19 }
 0x518   :  { %1163 = vperm.xlu0 %1450, %v1157_v31   ;;  %v1159_v13 = vmul.f32 %v1157_v31, %v1150_v22 }
 0x51a   :  { %v1160_v34 = vsub.f32 %v1158_v24, %v1159_v13 }
 0x51c   :  { %1174 = vperm.xlu1 %1451, %v1160_v34  }
 0x597   :  { %v1164_v63 = vpop.permute.xlu0 %1163 }
 0x598   :  { %v1166_v53 = vmul.f32 %v1164_v63, %v977_v6  ;;  %v1167_v41 = vmul.f32 %v1164_v63, %v979_v47  ;;  %v1168_v32 = vmul.f32 %v1164_v63, %v1048_v28  ;;  %v1169_v29 = vmul.f32 %v1164_v63, %v1050_v14 }
 0x599   :  { %v1170_v20 = vmul.f32 %v1164_v63, %v1119_v59  ;;  %v1171_v44 = vmul.f32 %v1164_v63, %v1121_v38 }
 0x59b   :  { %v1175_v35 = vpop.permute.xlu1 %1174 }
 0x59c   :  { %v1177_v1 = vadd.f32 %v1175_v35, %v1166_v53  ;;  %v1178_v8 = vadd.f32 %v1175_v35, %v1167_v41  ;;  %v1179_v40 = vadd.f32 %v1175_v35, %v1168_v32  ;;  %v1180_v54 = vadd.f32 %v1175_v35, %v1169_v29 }
 0x59d   :  { %v1181_v58 = vadd.f32 %v1175_v35, %v1170_v20  ;;  %v1182_v37 = vadd.f32 %v1175_v35, %v1171_v44 }
 0x59e   :  { %v1189_v42 = vmul.f32 0.70710677, %v1177_v1  ;;  %v1190_v49 = vmul.f32 0.70710677, %v1178_v8  ;;  %v1191_v7 = vmul.f32 0.70710677, %v1179_v40 }
 0x59f   :  { %v1192_v21 = vmul.f32 0.70710677, %v1180_v54  ;;  %v1193_v57 = vmul.f32 0.70710677, %v1181_v58  ;;  %v1194_v60 = vmul.f32 0.70710677, %v1182_v37 }
 0x5a0   :  { %1558 = verf.f32 %v1189_v42  ;;  %v1183_v5 = vmul.f32 0.5, %v1177_v1  ;;  %v1184_v47 = vmul.f32 0.5, %v1178_v8  ;;  %v1185_v55 = vmul.f32 0.5, %v1179_v40 }
 0x5a1   :  { %1560 = verf.f32 %v1190_v49  ;;  %v1186_v62 = vmul.f32 0.5, %v1180_v54  ;;  %v1187_v15 = vmul.f32 0.5, %v1181_v58  ;;  %v1188_v56 = vmul.f32 0.5, %v1182_v37 }
 0x5a2   :  { %1562 = verf.f32 %v1191_v7 }
 0x5a3   :  { %1564 = verf.f32 %v1192_v21 }
 0x5a4   :  { %1566 = verf.f32 %v1193_v57 }
 0x5a5   :  { %1568 = verf.f32 %v1194_v60 }
 0x5aa   :  { %v1559_v52 = vpop.eup %1558 }
 0x5ab   :  { %v1561_v2 = vpop.eup %1560  ;;  %v1201_v6 = vadd.f32 1.0, %v1559_v52 }
 0x5ac   :  { %v1563_v0 = vpop.eup %1562  ;;  %v1202_v50 = vadd.f32 1.0, %v1561_v2 }
 0x5ad   :  { %v1565_v51 = vpop.eup %1564  ;;  %v1203_v61 = vadd.f32 1.0, %v1563_v0  ;;  %v1207_v23 = vmul.f32 %v1201_v6, %v1183_v5 }
 0x5ae   :  { %v1567_v28 = vpop.eup %1566  ;;  %v1204_v14 = vadd.f32 1.0, %v1565_v51  ;;  %v1208_v3 = vmul.f32 %v1202_v50, %v1184_v47 }
 0x5af   :  { %v1569_v4 = vpop.eup %1568  ;;  %v1205_v16 = vadd.f32 1.0, %v1567_v28  ;;  %v1209_v59 = vmul.f32 %v1203_v61, %v1185_v55  ;;  %v1213_v25 = vadd.f32 %v1570_v33, %v1207_v23 }
 0x5b0   :  { %v1206_v38 = vadd.f32 1.0, %v1569_v4  ;;  %v1210_v30 = vmul.f32 %v1204_v14, %v1186_v62  ;;  %v1214_v11 = vadd.f32 %v1571_v46, %v1208_v3 }
 0x5b1   :  { %v1211_v36 = vmul.f32 %v1205_v16, %v1187_v15  ;;  %v1215_v48 = vadd.f32 %v1572_v17, %v1209_v59  ;;  %v1219_v12 = vmul.f32 0.7072136, %v1213_v25 }
 0x5b2   :  { %v1212_v45 = vmul.f32 %v1206_v38, %v1188_v56  ;;  %v1216_v22 = vadd.f32 %v1573_v18, %v1210_v30  ;;  %v1220_v9 = vmul.f32 0.7072136, %v1214_v11 }
 0x5b3   :  { %v1217_v43 = vadd.f32 %v1574_v26, %v1211_v36  ;;  %v1221_v27 = vmul.f32 0.7072136, %v1215_v48  ;;  %1225 = vst [vmem:[#allocation6] sm:$0xff] %v1219_v12 }
 0x5b4   :  { %v1218_v19 = vadd.f32 %v1575_v10, %v1212_v45  ;;  %v1222_v39 = vmul.f32 0.7072136, %v1216_v22  ;;  %1226 = vst [vmem:[#allocation6 + $0x8] sm:$0xff] %v1220_v9 }
 0x5b5   :  { %v1223_v31 = vmul.f32 0.7072136, %v1217_v43  ;;  %1227 = vst [vmem:[#allocation6 + $0x10] sm:$0xff] %v1221_v27 }
 0x5b6   :  { %v1224_v24 = vmul.f32 0.7072136, %v1218_v19  ;;  %1228 = vst [vmem:[#allocation6 + $0x18] sm:$0xff] %v1222_v39 }
 0x5b7   :  { %1229 = vst [vmem:[#allocation6 + $0x20] sm:$0xff] %v1223_v31 }
 0x5b8   :  { %1230 = vst [vmem:[#allocation6 + $0x28] sm:$0xff] %v1224_v24 }
 0x5b9   :  { %1609 = shalt.err (!%p1606_p12)
}
 0x5ba   :  { %s1610_s14 = scalar_lea.hbm %s2342_s8, 768 }
 0x5bb   :  { %p1611_p13 = scmp.ne.s32.totalorder %s2342_s8, %s1610_s14  ;;  %p1614_p0 = scmp.lt.u32.totalorder %s1610_s14, %s2342_s8 }
 0x5bd   :  { %p1616_p1 = pnand %p1614_p0, %p1611_p13 }
 0x5bf   :  { %1619 = shalt.err (!%p1616_p1)
}
 0x5c0   :  { %1240 = dma.vmem_to_hbm [thread:$0]  %s1238_s7, 768, %s2342_s8, [#allocation5]  }
 0x5c1   :  { %1622 = dma.done.wait [#allocation5], 768  }
 0x5c2   :  { %1623 = vsyncadd [#allocation5], 4294966528 }
 0x5c3   :  { %1244 = vsyncpa [#allocation4], 1 }
 0x5c4   :  { %1245 = vsyncpa [#allocation5], 1 }

</bundles_post_ra>
